<compile_context>
chip_gen: v7x
topology: tpu7x:2x2x1
jax: 0.10.0
libtpu: 0.0.40
codegen_flags: <defaults>
</compile_context>

<pallas_src>
import functools

import jax
import jax.numpy as jnp
from jax.experimental import pallas as pl
from jax.experimental.pallas import tpu as pltpu


def _round_up(x: int, m: int) -> int:
    return ((x + m - 1) // m) * m


def classifier_kernel(x_ref, w1_ref, b1_ref, w2_ref, b2_ref, o_ref):
    # ReLU in f32 (v5e has no bf16 VALU), then one cast to bf16 for the MXU.
    x = jnp.maximum(x_ref[...], 0.0).astype(jnp.bfloat16)
    # Linear 1: bf16 operands, f32 accumulation, f32 bias add.
    h = jnp.dot(x, w1_ref[...], preferred_element_type=jnp.float32) + b1_ref[...]
    # Dropout(p=0.25) in eval mode -> identity.
    h = jnp.maximum(h, 0.0).astype(jnp.bfloat16)
    # Linear 2: narrow (out_features-wide) head; masked vst is fine (HBM-bound).
    y = jnp.dot(h, w2_ref[...], preferred_element_type=jnp.float32) + b2_ref[...]
    o_ref[...] = y.astype(o_ref.dtype)


def prepare_params(w1, b1, w2, b2):
    """One-time parameter prep (hoisted out of the per-call path):
    bf16 MXU weights, 2-D f32 biases. Weights are (in, out) layout."""
    hidden = w1.shape[1]
    out_f = w2.shape[1]
    w1_p = w1.astype(jnp.bfloat16)                       # (in, hidden)  bf16
    b1_p = b1.reshape(1, hidden).astype(jnp.float32)     # (1, hidden)   f32
    w2_p = w2.astype(jnp.bfloat16)                       # (hidden, out) bf16
    b2_p = b2.reshape(1, out_f).astype(jnp.float32)      # (1, out)      f32
    return w1_p, b1_p, w2_p, b2_p


@functools.partial(jax.jit, static_argnames=("block_b",))
def classifier_forward(x, w1_p, b1_p, w2_p, b2_p, *, block_b=2048):
    """x: (B, in_features) f32. Prepared params from prepare_params().
    Returns (B, out_features) f32."""
    B, in_f = x.shape
    hidden = w1_p.shape[1]
    out_f = w2_p.shape[1]

    # Batch tile: grow with B (large tiles amortize ~0.35us/step overhead), but
    # target >=2 grid steps so v7x's second TensorCore gets work. Multiple of 8.
    tb = min(block_b, max(8, _round_up(pl.cdiv(B, 2), 8)))
    grid = (pl.cdiv(B, tb),)

    flops = 2 * B * (in_f * hidden + hidden * out_f)
    bytes_accessed = (
        B * in_f * 4                      # x read (f32)
        + w1_p.size * 2 + w2_p.size * 2   # bf16 weights
        + b1_p.size * 4 + b2_p.size * 4   # f32 biases
        + B * out_f * 4                   # output write (f32)
    )

    out = pl.pallas_call(
        classifier_kernel,
        out_shape=jax.ShapeDtypeStruct((B, out_f), jnp.float32),
        grid=grid,
        in_specs=[
            pl.BlockSpec((tb, in_f), lambda i: (i, 0)),      # x: tiled over batch
            pl.BlockSpec((in_f, hidden), lambda i: (0, 0)),  # w1: resident
            pl.BlockSpec((1, hidden), lambda i: (0, 0)),     # b1: resident
            pl.BlockSpec((hidden, out_f), lambda i: (0, 0)), # w2: resident
            pl.BlockSpec((1, out_f), lambda i: (0, 0)),      # b2: resident
        ],
        out_specs=pl.BlockSpec((tb, out_f), lambda i: (i, 0)),
        compiler_params=pltpu.CompilerParams(
            dimension_semantics=("parallel",)),
        cost_estimate=pl.CostEstimate(
            flops=flops, transcendentals=0, bytes_accessed=bytes_accessed),
    )(x, w1_p, b1_p, w2_p, b2_p)

    return out


def init_params(key, in_features, hidden_size, out_features):
    """Deterministic init mimicking nn.Linear's uniform(-1/sqrt(fan_in), +).
    Weights stored transposed relative to PyTorch: (in, out)."""
    k1, k2, k3, k4 = jax.random.split(key, 4)
    lim1 = 1.0 / jnp.sqrt(in_features)
    lim2 = 1.0 / jnp.sqrt(hidden_size)
    w1 = jax.random.uniform(k1, (in_features, hidden_size), jnp.float32, -lim1, lim1)
    b1 = jax.random.uniform(k2, (hidden_size,), jnp.float32, -lim1, lim1)
    w2 = jax.random.uniform(k3, (hidden_size, out_features), jnp.float32, -lim2, lim2)
    b2 = jax.random.uniform(k4, (out_features,), jnp.float32, -lim2, lim2)
    return w1, b1, w2, b2


def _reference(x, w1, b1, w2, b2):
    """Pure-JAX reference mirroring the kernel's bf16-operand / f32-accumulate math."""
    xr = jnp.maximum(x, 0.0).astype(jnp.bfloat16)
    h = jnp.dot(xr, w1.astype(jnp.bfloat16), preferred_element_type=jnp.float32) + b1
    h = jnp.maximum(h, 0.0).astype(jnp.bfloat16)
    return jnp.dot(h, w2.astype(jnp.bfloat16), preferred_element_type=jnp.float32) + b2


if __name__ == "__main__":
    key = jax.random.PRNGKey(0)
    B, in_features, hidden_size, out_features = 8, 32, 256, 8

    kx, kp, kx2 = jax.random.split(key, 3)
    x = jax.random.normal(kx, (B, in_features), jnp.float32)
    w1, b1, w2, b2 = init_params(kp, in_features, hidden_size, out_features)
    w1_p, b1_p, w2_p, b2_p = prepare_params(w1, b1, w2, b2)

    # Small-batch path (single grid step, partial block masked at B=8 -> tb=8).
    y = classifier_forward(x, w1_p, b1_p, w2_p, b2_p)
    jax.block_until_ready(y)
    ref = _reference(x, w1, b1, w2, b2)
    assert y.shape == (B, out_features)
    assert jnp.allclose(y, ref, atol=1e-3, rtol=1e-3)

    # Multi-step grid + partial last block: B=300 -> tb=152, grid=(2,),
    # rows 300..303 of the last block are OOB and masked by Pallas.
    B2 = 300
    x2 = jax.random.normal(kx2, (B2, in_features), jnp.float32)
    y2 = classifier_forward(x2, w1_p, b1_p, w2_p, b2_p)
    jax.block_until_ready(y2)
    ref2 = _reference(x2, w1, b1, w2, b2)
    assert y2.shape == (B2, out_features)
    assert jnp.allclose(y2, ref2, atol=1e-3, rtol=1e-3)

    print("KERNEL_OK")
</pallas_src>

<mosaic_0001>
module attributes {stable_mosaic.version = 11 : i64} {
  func.func @classifier_kernel(%arg0: i32, %arg1: memref<8x32xf32, #tpu.memory_space<vmem>>, %arg2: memref<32x256xbf16, #tpu.memory_space<vmem>>, %arg3: memref<1x256xf32, #tpu.memory_space<vmem>>, %arg4: memref<256x8xbf16, #tpu.memory_space<vmem>>, %arg5: memref<1x8xf32, #tpu.memory_space<vmem>>, %arg6: memref<8x8xf32, #tpu.memory_space<vmem>>) attributes {dimension_semantics = [#tpu.dimension_semantics<parallel>], iteration_bounds = array<i64: 1>, scalar_prefetch = 0 : i64, scratch_operands = 0 : i64, tpu.core_type = #tpu.core_type<tc>, window_params = [{transform_indices = @transform_0, window_bounds = array<i64: 8, 32>}, {pipeline_mode = #tpu.pipeline_mode<synchronous>, transform_indices = @transform_1, window_bounds = array<i64: 32, 256>}, {pipeline_mode = #tpu.pipeline_mode<synchronous>, transform_indices = @transform_2, window_bounds = array<i64: 1, 256>}, {pipeline_mode = #tpu.pipeline_mode<synchronous>, transform_indices = @transform_3, window_bounds = array<i64: 256, 8>}, {pipeline_mode = #tpu.pipeline_mode<synchronous>, transform_indices = @transform_4, window_bounds = array<i64: 1, 8>}, {transform_indices = @transform_5, window_bounds = array<i64: 8, 8>}]} {
    %c0 = arith.constant 0 : index
    %c0_0 = arith.constant 0 : index
    %0 = vector.load %arg1[%c0, %c0_0] : memref<8x32xf32, #tpu.memory_space<vmem>>, vector<8x32xf32>
    %cst = arith.constant 0.000000e+00 : f32
    %1 = vector.broadcast %cst : f32 to vector<8x32xf32>
    %2 = arith.maximumf %0, %1 : vector<8x32xf32>
    %3 = arith.truncf %2 : vector<8x32xf32> to vector<8x32xbf16>
    %c0_1 = arith.constant 0 : index
    %c0_2 = arith.constant 0 : index
    %4 = vector.load %arg2[%c0_1, %c0_2] : memref<32x256xbf16, #tpu.memory_space<vmem>>, vector<32x256xbf16>
    %cst_3 = arith.constant dense<0.000000e+00> : vector<8x256xf32>
    %5 = tpu.matmul %3, %4, %cst_3 {dimension_numbers = #tpu.dot_dimension_numbers<[1], [0], [0], [1], [0, 0, 1, 1], [], []>} : vector<8x32xbf16>, vector<32x256xbf16>, vector<8x256xf32> -> vector<8x256xf32>
    %c0_4 = arith.constant 0 : index
    %c0_5 = arith.constant 0 : index
    %6 = vector.load %arg3[%c0_4, %c0_5] : memref<1x256xf32, #tpu.memory_space<vmem>>, vector<1x256xf32>
    %7 = vector.broadcast %6 : vector<1x256xf32> to vector<8x256xf32>
    %8 = arith.addf %5, %7 : vector<8x256xf32>
    %cst_6 = arith.constant 0.000000e+00 : f32
    %9 = vector.broadcast %cst_6 : f32 to vector<8x256xf32>
    %10 = arith.maximumf %8, %9 : vector<8x256xf32>
    %11 = arith.truncf %10 : vector<8x256xf32> to vector<8x256xbf16>
    %c0_7 = arith.constant 0 : index
    %c0_8 = arith.constant 0 : index
    %12 = vector.load %arg4[%c0_7, %c0_8] : memref<256x8xbf16, #tpu.memory_space<vmem>>, vector<256x8xbf16>
    %cst_9 = arith.constant dense<0.000000e+00> : vector<8x8xf32>
    %13 = tpu.matmul %11, %12, %cst_9 {dimension_numbers = #tpu.dot_dimension_numbers<[1], [0], [0], [1], [0, 0, 1, 1], [], []>} : vector<8x256xbf16>, vector<256x8xbf16>, vector<8x8xf32> -> vector<8x8xf32>
    %c0_10 = arith.constant 0 : index
    %c0_11 = arith.constant 0 : index
    %14 = vector.load %arg5[%c0_10, %c0_11] : memref<1x8xf32, #tpu.memory_space<vmem>>, vector<1x8xf32>
    %15 = vector.broadcast %14 : vector<1x8xf32> to vector<8x8xf32>
    %16 = arith.addf %13, %15 : vector<8x8xf32>
    %c0_12 = arith.constant 0 : index
    %c0_13 = arith.constant 0 : index
    %17 = vector.load %arg6[%c0_12, %c0_13] : memref<8x8xf32, #tpu.memory_space<vmem>>, vector<8x8xf32>
    tpu.vector_store %arg6[%c0_12, %c0_13], %16 {strides = array<i32>} : memref<8x8xf32, #tpu.memory_space<vmem>>, vector<8x8xf32>,
    return
  }
  func.func @transform_0(%arg0: i32) -> (i32, i32) {
    %c0_i32 = arith.constant 0 : i32
    %c0_i32_0 = arith.constant 0 : i32
    return %arg0, %c0_i32 : i32, i32
  }
  func.func @transform_1(%arg0: i32) -> (i32, i32) {
    %c0_i32 = arith.constant 0 : i32
    %c0_i32_0 = arith.constant 0 : i32
    %c0_i32_1 = arith.constant 0 : i32
    return %c0_i32, %c0_i32_0 : i32, i32
  }
  func.func @transform_2(%arg0: i32) -> (i32, i32) {
    %c0_i32 = arith.constant 0 : i32
    %c0_i32_0 = arith.constant 0 : i32
    %c0_i32_1 = arith.constant 0 : i32
    return %c0_i32, %c0_i32_0 : i32, i32
  }
  func.func @transform_3(%arg0: i32) -> (i32, i32) {
    %c0_i32 = arith.constant 0 : i32
    %c0_i32_0 = arith.constant 0 : i32
    %c0_i32_1 = arith.constant 0 : i32
    return %c0_i32, %c0_i32_0 : i32, i32
  }
  func.func @transform_4(%arg0: i32) -> (i32, i32) {
    %c0_i32 = arith.constant 0 : i32
    %c0_i32_0 = arith.constant 0 : i32
    %c0_i32_1 = arith.constant 0 : i32
    return %c0_i32, %c0_i32_0 : i32, i32
  }
  func.func @transform_5(%arg0: i32) -> (i32, i32) {
    %c0_i32 = arith.constant 0 : i32
    %c0_i32_0 = arith.constant 0 : i32
    return %arg0, %c0_i32 : i32, i32
  }
}

</mosaic_0001>

<bundles_post_ra>
// kernel: classifier_forward.1
= control target key start
LH: loop header
LB: loop body
LE: loop exit
PB: predicated region body
PF: predicated region fallthrough
CT: control target
= control target key end

     0   :  { %v393_v2 = vmov 0   ;;  %vm61_vm0 = vcmask 261120   ;;  %s506_s0 = inlined_call_operand.vmem [shape: f32[8,32], index: 0, kind: input, shape index: {}]   ;;  %s507_s1 = inlined_call_operand.vmem [shape: bf16[32,256], index: 1, kind: input, shape index: {}]   ;;  %s508_s2 = inlined_call_operand.vmem [shape: f32[1,256], index: 2, kind: input, shape index: {}]   ;;  %s509_s3 = inlined_call_operand.vmem [shape: bf16[256,8], index: 3, kind: input, shape index: {}]   ;;  %s510_s4 = inlined_call_operand.vmem [shape: f32[1,8], index: 4, kind: input, shape index: {}]   ;;  %s511_s5 = inlined_call_operand.hbm [shape: f32[8,8], index: 5, kind: output, shape index: {}]  }
   0x1   :  { %v347_v0 = vld [vmem:[%s507_s1 + $0x4] ss:$8 sps:$4 sm:$0xff]   ;;  %v349_v1 = vld [vmem:[%s507_s1] ss:$8 sps:$4 sm:$0xff]   ;;  %97 = vmatprep.mubr.bf16.mxu0 %v393_v2  ;;  %v350_v3 = vld [vmem:[%s507_s1 + $0x14] ss:$8 sps:$4 sm:$0xff]  }
   0x2   :  { %65 = vmatprep.subr.bf16.mxu0 %v347_v0  ;;  %v352_v4 = vld [vmem:[%s507_s1 + $0x10] ss:$8 sps:$4 sm:$0xff]   ;;  %v22_v5 = vld [vmem:[%s506_s0] sm:$0xff]  ;;  %v355_v9 = vld [vmem:[%s509_s3 + $0x48] sm:$0xff]  }
   0x3   :  { %66 = vmatpush1.bf16.msra.mxu0 %v349_v1  ;;  %v23_v6 = vmax.f32 %v22_v5, 0.0  ;;  %v353_v7 = vld [vmem:[%s509_s3 + $0x40] sm:$0xff]   ;;  %v356_v11 = vld [vmem:[%s509_s3 + $0x8] sm:$0xff]   ;;  %v357_v12 = vld [vmem:[%s509_s3 + $0x50] sm:$0xff]  }
   0x4   :  { %67 = vmatprep.subr.bf16.mxu0 %v350_v3  ;;  %v354_v8 = vld [vmem:[%s509_s3] sm:$0xff]   ;;  %323 = vmatprep.subr.bf16.mxu1 %v353_v7  ;;  %v358_v13 = vld [vmem:[%s509_s3 + $0x10] sm:$0xff]   ;;  %v359_v14 = vld [vmem:[%s509_s3 + $0x58] sm:$0xff]  }
   0x5   :  { %v24_v10 = vpack.c.bf16 %v23_v6, %v23_v6  ;;  %324 = vmatpush3.bf16.msra.mxu1 %v354_v8  ;;  %v360_v15 = vld [vmem:[%s509_s3 + $0x18] sm:$0xff]   ;;  %v361_v16 = vld [vmem:[%s509_s3 + $0x60] sm:$0xff]  }
   0x6   :  { %325 = vmatprep.subr.bf16.mxu1 %v355_v9  ;;  %v362_v17 = vld [vmem:[%s509_s3 + $0x20] sm:$0xff]  }
   0x7   :  { %68 = vmatpush1.bf16.msra.mxu0 %v352_v4 }
   0x9   :  { %326 = vmatpush3.bf16.msra.mxu1 %v356_v11 }
   0xa   :  { %305 = vmatmul.mubr.msk.bf16.vlgmr.msra.gmra.mrb[0].mxu0 %vm61_vm0, %v24_v10  ;;  %327 = vmatprep.subr.bf16.mxu1 %v357_v12 }
   0xd   :  { %328 = vmatpush3.bf16.msra.mxu1 %v358_v13 }
   0xe   :  { %329 = vmatprep.subr.bf16.mxu1 %v359_v14 }
  0x11   :  { %330 = vmatpush3.bf16.msra.mxu1 %v360_v15 }
  0x12   :  { %10 = vsyncpa [#allocation3], 0  ;;  %331 = vmatprep.subr.bf16.mxu1 %v361_v16  ;;  %v363_v18 = vld [vmem:[%s509_s3 + $0x68] sm:$0xff]   ;;  %v365_v20 = vld [vmem:[%s509_s3 + $0x70] sm:$0xff]   ;;  %v31_v24 = vlaneseq  ;;  %vm285_vm1 = vcmask 64512  }
  0x13   :  { %v364_v19 = vld [vmem:[%s509_s3 + $0x28] sm:$0xff]   ;;  %v366_v21 = vld [vmem:[%s509_s3 + $0x30] sm:$0xff]   ;;  %v367_v22 = vld [vmem:[%s509_s3 + $0x78] sm:$0xff]  }
  0x14   :  { %v368_v23 = vld [vmem:[%s509_s3 + $0x38] sm:$0xff]   ;;  %v32_v25 = vshrl.u32 %v31_v24, 7  ;;  %v29_v27 = vld [vmem:[%s508_s2] sm:$0x3]  ;;  %s394_s2 = smov [#allocation2]  }
  0x15   :  { %332 = vmatpush3.bf16.msra.mxu1 %v362_v17  ;;  %v306_v42 = vld [vmem:[%s510_s4] ss:$0 sm:$0xff]  ;;  %s293_s9 = sshll.u32 %s394_s2, 4  ;;  %s294_s9 = int_to_ptr.vmem [resolvable:$true] %s293_s9 }
  0x16   :  { %333 = vmatprep.subr.bf16.mxu1 %v363_v18  ;;  %v33_v26 = vsub.s32 0, %v32_v25  ;;  %v37_v28 = vsub.s32 1, %v32_v25  ;;  %s369_s10 = scalar_lea.vmem %s294_s9, 128  ;;  %p374_p1 = scmp.lt.s32.totalorder %s294_s9, %s294_s9 }
  0x17   :  { %p370_p0 = scmp.ne.s32.totalorder %s294_s9, %s369_s10  ;;  %p375_p2 = scmp.lt.s32.totalorder %s369_s10, %s369_s10 }
  0x18   :  { %v34_v29 = vrot.slane %v29_v27, %v33_v26  ;;  %v38_v30 = vrot.slane %v29_v27, %v37_v28 }
  0x19   :  { %334 = vmatpush3.bf16.msra.mxu1 %v364_v19  ;;  %p376_p3 = por %p375_p2, %p374_p1 }
  0x1a   :  { %335 = vmatprep.subr.bf16.mxu1 %v365_v20 }
  0x1b   :  { %p377_p4 = pnand %p376_p3, %p370_p0 }
  0x1d   :  { %336 = vmatpush3.bf16.msra.mxu1 %v366_v21 }
  0x1e   :  { %337 = vmatprep.subr.bf16.mxu1 %v367_v22 }
  0x21   :  { %338 = vmatpush3.bf16.msra.mxu1 %v368_v23 }
  0xdd   :  { %v99_v31 = vpop.f32.mrb[0].mxu0 }
  0xde   :  { %v100_v32 = vadd.f32 %v99_v31, %v34_v29  ;;  %v101_v33 = vpop.f32.mrb[1].mxu0 }
  0xdf   :  { %v102_v34 = vadd.f32 %v101_v33, %v38_v30  ;;  %v103_v35 = vpop.f32.mrb[2].mxu0 }
  0xe0   :  { %v106_v36 = vmax.f32 %v100_v32, 0.0  ;;  %v104_v37 = vpop.f32.mrb[3].mxu0 }
  0xe1   :  { %v107_v38 = vmax.f32 %v102_v34, 0.0 }
  0xe2   :  { %v108_v40 = vpack.c.bf16 %v106_v36, %v106_v36 }
  0xe3   :  { %v109_v39 = vpack.c.bf16 %v107_v38, %v107_v38 }
  0xe5   :  { %277 = vmatprep.mubr.bf16.mxu1 %v109_v39 }
  0xe6   :  { %278 = vmatmul.mubr.bf16.vlgmr.msra.gmra.mrb[0].mxu1 %v108_v40 }
 0x1b9   :  { %v339_v41 = vpop.f32.mrb[0].mxu1 }
 0x1ba   :  { %v340_v43 = vpop.f32.mrb[1].mxu1 }
 0x1bb   :  { %v341_v44 = vadd.f32 %v340_v43, %v339_v41  ;;  %v342_v45 = vpop.f32.mrb[2].mxu1 }
 0x1bc   :  { %v343_v46 = vpop.f32.mrb[3].mxu1 }
 0x1bd   :  { %v280_v47 = vadd.f32 %v341_v44, %v306_v42 }
 0x1bf   :  { %286 = vst.msk [vmem:[#allocation2] sm:$0xff] %vm285_vm1, %v280_v47 }
 0x1c0   :  { %380 = shalt.err (!%p377_p4)
}
 0x1c1   :  { %s381_s4 = scalar_lea.hbm %s511_s5, 128 }
 0x1c2   :  { %p382_p5 = scmp.ne.s32.totalorder %s511_s5, %s381_s4  ;;  %p385_p6 = scmp.lt.u32.totalorder %s381_s4, %s511_s5 }
 0x1c4   :  { %p387_p7 = pnand %p385_p6, %p382_p5 }
 0x1c6   :  { %390 = shalt.err (!%p387_p7)
}
 0x1c7   :  { %296 = dma.vmem_to_hbm [thread:$0]  %s294_s9, 128, %s511_s5, [#allocation3]  }
 0x1c8   :  { %391 = dma.done.wait [#allocation3], 128  }
 0x1c9   :  { %392 = vsyncadd [#allocation3], 4294967168 }
 0x1ca   :  { %300 = vsyncpa [#allocation3], 1 }

</bundles_post_ra>
